<compile_context>
chip_gen: v7x
topology: tpu7x:2x2x1
jax: 0.10.0
libtpu: 0.0.40
codegen_flags: <defaults>
</compile_context>

<pallas_src>
import math
import numpy as np

import jax
import jax.numpy as jnp
from jax.experimental import pallas as pl
from jax.experimental.pallas import tpu as pltpu

DIM = 5
LANE = 128
SUB = 8
KB_FC = 64   # col_f rows contracted per fc grid step (k=128 -> 2 steps)


# ----------------------------------------------------------------------------
# small host-side helpers (glue)
# ----------------------------------------------------------------------------
def _ru(x, m):
    return ((x + m - 1) // m) * m


def fact(n):
    return math.factorial(n)


def comb(n, k):
    return math.comb(n, k)


def get_factor_lst(extent):
    return [i for i in range(1, extent + 1) if extent % i == 0]


def embed_factors(factors, dim=DIM, k=10):
    # Embed module: base-k digits (low -> high), truncated / zero padded to dim
    ret = []
    for f in factors:
        f = int(f)
        tmp = []
        while f > 0:
            tmp.append(f % k)
            f = f // k
        cha = max(0, dim - len(tmp))
        tmp = tmp[:dim] + [0] * cha
        ret.append(tmp)
    return np.asarray(ret, dtype=np.float32)


def gumbel_softmax(log_probs, key, tau=1.0):
    # soft gumbel-softmax (torch default: tau=1, hard=False)
    u = jax.random.uniform(key, log_probs.shape, minval=1e-10, maxval=1.0)
    g = -jnp.log(-jnp.log(u))
    return jax.nn.softmax((log_probs + g) / tau, axis=-1)


def _linear(key, fan_in, fan_out):
    # deterministic synthetic nn.Linear init (uniform +- 1/sqrt(fan_in))
    k1, k2 = jax.random.split(key)
    bound = 1.0 / math.sqrt(fan_in)
    W = jax.random.uniform(k1, (fan_in, fan_out), jnp.float32, -bound, bound)
    b = jax.random.uniform(k2, (fan_out,), jnp.float32, -bound, bound)
    return W, b


def _pad_w(W, rows, cols):
    return jnp.pad(W, ((0, rows - W.shape[0]), (0, cols - W.shape[1])))


def _pad_b(b, cols):
    return jnp.pad(b, (0, cols - b.shape[0])).reshape(1, cols)


# ----------------------------------------------------------------------------
# Pallas kernels
# ----------------------------------------------------------------------------
def _sasd_kernel(meta_ref, x_ref, wa_ref, ba_ref, e_ref, wf_ref, bf_ref, out_ref):
    """Per head h (grid axis, 'parallel'):
       value = softmax( sum_n tanh(X @ Wa + ba) @ tanh(E @ Wf + bf)^T , dim=0 )
    Linearity: sum over rows first, then one [1,H]x[H,F] contraction.
    X / Wa / E / Wf are bf16, accumulation f32."""
    h = pl.program_id(0)
    n_valid = meta_ref[h, 0]
    f_valid = meta_ref[h, 1]

    x = x_ref[0]                                   # (Np, 128) bf16
    filt = jnp.tanh(
        jnp.dot(x, wa_ref[0], preferred_element_type=jnp.float32) + ba_ref[0]
    )
    rows = jax.lax.broadcasted_iota(jnp.int32, filt.shape, 0)
    filt = jnp.where(rows < n_valid, filt, 0.0)    # mask padded batch rows
    s_filt = jnp.sum(filt, axis=0, keepdims=True)  # (1, H)

    ff = jnp.tanh(
        jnp.dot(e_ref[0], wf_ref[0], preferred_element_type=jnp.float32) + bf_ref[0]
    )                                              # (Fp, H)

    # s[0, f] = sum_h s_filt[h] * ff[f, h]  (transposed-RHS contraction, no .T)
    s = jax.lax.dot_general(
        s_filt, ff, (((1,), (1,)), ((), ())), preferred_element_type=jnp.float32
    )                                              # (1, Fp)

    cols = jax.lax.broadcasted_iota(jnp.int32, s.shape, 1)
    valid = cols < f_valid
    s = jnp.where(valid, s, -jnp.inf)
    m = jnp.max(s, axis=-1, keepdims=True)
    e = jnp.where(valid, jnp.exp(s - m), 0.0)
    out_ref[0] = e / jnp.sum(e, axis=-1, keepdims=True)   # (1, 128) lane-dense


def _sard_fused_kernel(meta_ref, x_ref, s_ref, wa_ref, ba_ref, wr_ref, br_ref,
                       wc_ref, bc_ref, wfc_ref, bfc_ref, out_ref, colf_scr):
    """Fused SARD forward:
         act   = relu(X @ Wa + ba)                      (Np, H)
         pack  = S @ act                                (num_pad, H)  group sums
         row_f = tanh(pack @ Wr + br)                   (num_pad, k)
         col_f = tanh(row_f^T-contract-Wc + bc)         (k, l)
         probs = softmax(flatten(col_f) @ Wfc + bfc)    (1, Op) masked to outputs
       The fc contraction streams Wfc (host-reshaped to (k, l, Op) bf16) over
       the grid axis in KB_FC-row chunks and accumulates per-row (1,l)@(l,Op)
       MXU GEMVs into the resident output block.  col_f stays resident in a
       VMEM scratch -> no HBM round trip, no sublane->lane flatten relayout."""
    a = pl.program_id(0)
    kb = wfc_ref.shape[0]          # KB_FC
    na = colf_scr.shape[0]         # k // KB_FC

    @pl.when(a == 0)
    def _():
        act = jnp.maximum(
            jnp.dot(x_ref[...], wa_ref[...], preferred_element_type=jnp.float32)
            + ba_ref[...], 0.0
        )                                                               # (Np, 128)
        # S selects & sums the valid rows of each group (zeros for empty groups)
        pack = jnp.dot(s_ref[...], act, preferred_element_type=jnp.float32)
        row_f = jnp.tanh(
            jnp.dot(pack, wr_ref[...], preferred_element_type=jnp.float32)
            + br_ref[...]
        )                                                               # (num_pad, k)
        # col_f[a,b] = tanh(sum_g row_f[g,a]*Wc[g,b] + bc[b]); padded Wc rows = 0
        col_f = jnp.tanh(
            jax.lax.dot_general(row_f, wc_ref[...], (((0,), (0,)), ((), ())),
                                preferred_element_type=jnp.float32)
            + bc_ref[...]
        )                                                               # (k, l) f32
        for c in range(na):
            colf_scr[c] = col_f[c * kb:(c + 1) * kb, :]
        out_ref[...] = jnp.zeros_like(out_ref)

    # fc partial for rows [a*kb, (a+1)*kb) of the row-major flatten.
    cf_view = colf_scr.at[a]                                            # (kb, l) view
    acc = jnp.zeros(out_ref.shape, jnp.float32)
    for r in range(kb):
        cf_row = cf_view[pl.ds(r, 1), :].astype(jnp.bfloat16)           # (1, l)
        acc = acc + jnp.dot(cf_row, wfc_ref[r],
                            preferred_element_type=jnp.float32)         # (1, Op)
    out_ref[...] += acc

    @pl.when(a == pl.num_programs(0) - 1)
    def _():
        out_valid = meta_ref[0]
        s = out_ref[...] + bfc_ref[...]
        cols = jax.lax.broadcasted_iota(jnp.int32, s.shape, 1)
        valid = cols < out_valid
        s = jnp.where(valid, s, -jnp.inf)
        m = jnp.max(s, axis=-1, keepdims=True)
        e = jnp.where(valid, jnp.exp(s - m), 0.0)
        out_ref[...] = e / jnp.sum(e, axis=-1, keepdims=True)


# ----------------------------------------------------------------------------
# pallas_call wrappers (jitted so the kernel trace is cached per shape)
# ----------------------------------------------------------------------------
@jax.jit
def sasd_batched_pallas(meta, X, Wa, ba, E, Wf, bf):
    H, Np, Dp = X.shape
    imap3 = lambda h, m: (h, 0, 0)
    return pl.pallas_call(
        _sasd_kernel,
        out_shape=jax.ShapeDtypeStruct((H, 1, LANE), jnp.float32),
        grid_spec=pltpu.PrefetchScalarGridSpec(
            num_scalar_prefetch=1,
            grid=(H,),
            in_specs=[
                pl.BlockSpec((1, Np, Dp), imap3),
                pl.BlockSpec((1, LANE, LANE), imap3),
                pl.BlockSpec((1, 1, LANE), imap3),
                pl.BlockSpec((1, LANE, LANE), imap3),
                pl.BlockSpec((1, LANE, LANE), imap3),
                pl.BlockSpec((1, 1, LANE), imap3),
            ],
            out_specs=pl.BlockSpec((1, 1, LANE), imap3),
        ),
        # TODO(synk): try pltpu.CORE_PARALLEL on v7x so the 5 heads shard 3/2
        # across the two TensorCores.
        compiler_params=pltpu.CompilerParams(dimension_semantics=("parallel",)),
    )(meta, X, Wa, ba, E, Wf, bf)


@jax.jit
def sard_fused_pallas(meta, X, S, Wa, ba, Wr, br, Wc, bc, Wfc3, bfc):
    Np, Dp = X.shape
    num_pad = S.shape[0]
    Kk, Ll, Op = Wfc3.shape
    assert Kk % KB_FC == 0 and Ll == LANE
    na = Kk // KB_FC
    const = lambda a, m: (0, 0)
    return pl.pallas_call(
        _sard_fused_kernel,
        out_shape=jax.ShapeDtypeStruct((1, Op), jnp.float32),
        grid_spec=pltpu.PrefetchScalarGridSpec(
            num_scalar_prefetch=1,
            grid=(na,),
            in_specs=[
                pl.BlockSpec((Np, Dp), const),                 # X   (resident)
                pl.BlockSpec((num_pad, Np), const),            # S
                pl.BlockSpec((Dp, LANE), const),               # Wa
                pl.BlockSpec((1, LANE), const),                # ba
                pl.BlockSpec((LANE, LANE), const),             # Wr
                pl.BlockSpec((1, LANE), const),                # br
                pl.BlockSpec((num_pad, LANE), const),          # Wc
                pl.BlockSpec((1, LANE), const),                # bc
                pl.BlockSpec((KB_FC, LANE, Op), lambda a, m: (a, 0, 0)),  # Wfc3 stream
                pl.BlockSpec((1, Op), const),                  # bfc
            ],
            out_specs=pl.BlockSpec((1, Op), const),
            scratch_shapes=[pltpu.VMEM((na, KB_FC, LANE), jnp.float32)],
        ),
        compiler_params=pltpu.CompilerParams(
            dimension_semantics=("arbitrary",),
            vmem_limit_bytes=32 * 1024 * 1024,
        ),
    )(meta, X, S, Wa, ba, Wr, br, Wc, bc, Wfc3, bfc)


# ----------------------------------------------------------------------------
# parameter construction
# ----------------------------------------------------------------------------
def _make_sasd_bank(key, din, hidden, n_heads):
    keys = jax.random.split(key, n_heads)
    Wa_l, ba_l, Wf_l, bf_l = [], [], [], []
    for kk in keys:
        k1, k2 = jax.random.split(kk)
        Wa, ba = _linear(k1, din, hidden)      # axis_filters: Linear(dim+length, hidden)
        Wf, bf = _linear(k2, DIM, hidden)      # factor_filters: Linear(embedding=5, hidden)
        Wa_l.append(_pad_w(Wa, LANE, LANE).astype(jnp.bfloat16))
        ba_l.append(_pad_b(ba, LANE))
        Wf_l.append(_pad_w(Wf, LANE, LANE).astype(jnp.bfloat16))
        bf_l.append(_pad_b(bf, LANE))
    return dict(Wa=jnp.stack(Wa_l), ba=jnp.stack(ba_l),
                Wf=jnp.stack(Wf_l), bf=jnp.stack(bf_l))


def _make_sard_params(key, din, hidden, num, k, l, outputs):
    ks = jax.random.split(key, 4)
    Wa, ba = _linear(ks[0], din, hidden)       # axis_filters
    Wr, br = _linear(ks[1], hidden, k)         # row_filter: Linear(hidden, k)
    Wc, bc = _linear(ks[2], num, l)            # col_filter: Linear(num, l)
    Wfc, bfc = _linear(ks[3], k * l, outputs)  # fc: Linear(k*l, outputs)
    num_pad = _ru(num, SUB)
    # small heads (sapd: 15 outputs) keep only 16 lanes -> 8x less Wfc stream
    op = 16 if outputs <= 16 else _ru(outputs, LANE)
    Wfc3 = _pad_w(Wfc, k * l, op).reshape(k, l, op).astype(jnp.bfloat16)
    return dict(
        num=num, num_pad=num_pad, outputs=outputs, k=k, l=l, op=op,
        Wa=_pad_w(Wa, LANE, LANE), ba=_pad_b(ba, LANE),
        Wr=_pad_w(Wr, LANE, k), br=_pad_b(br, k),
        Wc=_pad_w(Wc, num_pad, l), bc=_pad_b(bc, l),   # padded rows zero -> no garbage
        Wfc3=Wfc3,                                      # bf16 stream, f32 accumulate
        bfc=_pad_b(bfc, op),
    )


# ----------------------------------------------------------------------------
# OpScheduleCPUd5
# ----------------------------------------------------------------------------
class OpScheduleCPUd5:
    def __init__(self, length, hidden_dim, key):
        self.dim = DIM
        self.length = length
        self.hidden = hidden_dim
        din = DIM + length
        assert din <= LANE and hidden_dim <= LANE
        keys = jax.random.split(key, 6)
        self.sasd_spatial = _make_sasd_bank(keys[0], din, hidden_dim, DIM)
        self.sasd_reduce = _make_sasd_bank(keys[1], din, hidden_dim, DIM)
        f5 = fact(DIM)
        c_2d_d = comb(2 * DIM, DIM)
        p5 = (DIM + 1) * DIM // 2
        self.sard = [
            _make_sard_params(keys[2], din, hidden_dim, DIM, 128, 128, f5),
            _make_sard_params(keys[3], din, hidden_dim, DIM, 128, 128, f5),
            _make_sard_params(keys[4], din, hidden_dim, 2 * DIM, 128, 128, c_2d_d),
            _make_sard_params(keys[5], din, hidden_dim, DIM, 128, 128, p5),  # sapd
        ]
        self.rard_outputs = [f5, f5, c_2d_d, p5]

    # -- batched SASD forward (one Pallas launch for all 5 heads) ------------
    def _sasd_batched_forward(self, bank, candidates, extents, feature, shape_dict,
                              sampling, key):
        dim = self.dim
        rows_per_head, factors_per_head = [], []
        for i in range(dim):
            lst = feature[candidates[i]]
            rows = []
            for op_name, contents in lst:
                shp = list(map(float, shape_dict[op_name]))
                assert len(shp) == dim and len(contents) == self.length
                rows.append(shp + list(map(float, contents)))
            rows_per_head.append(rows)
            factors_per_head.append(get_factor_lst(int(extents[i])))

        max_n = max(len(r) for r in rows_per_head) if rows_per_head else 0
        Np = max(_ru(max(max_n, 1), SUB), SUB)
        X = np.zeros((dim, Np, LANE), np.float32)
        E = np.zeros((dim, LANE, LANE), np.float32)
        meta = np.zeros((dim, 2), np.int32)
        for i in range(dim):
            r = rows_per_head[i]
            if r:
                arr = np.asarray(r, np.float32)
                X[i, :arr.shape[0], :arr.shape[1]] = arr
            fs = factors_per_head[i]
            F = len(fs)
            assert F <= LANE
            E[i, :F, :DIM] = embed_factors(fs, DIM, 10)
            meta[i, 0] = len(r)
            meta[i, 1] = F

        out = sasd_batched_pallas(jnp.asarray(meta),
                                  jnp.asarray(X, jnp.bfloat16),
                                  bank["Wa"], bank["ba"],
                                  jnp.asarray(E, jnp.bfloat16),
                                  bank["Wf"], bank["bf"])          # (dim, 1, 128)

        keys = jax.random.split(key, dim)
        value_lst = []
        for i in range(dim):
            F = len(factors_per_head[i])
            v = out[i, 0, :F]
            if sampling:
                v = gumbel_softmax(jnp.log(v + 1e-20), keys[i])
            value_lst.append(v)
        # single device->host sync for all 5 choices (no per-head int() stalls)
        idx = jax.device_get(jnp.stack([jnp.argmax(v) for v in value_lst]))
        choice_lst = [factors_per_head[i][int(idx[i])] for i in range(dim)]
        return choice_lst, value_lst

    # -- SARD forward: ONE fused Pallas launch (feature + streamed fc softmax)
    def _sard_forward(self, p, lst, shape_dict, sampling, key):
        num, outputs, num_pad = p["num"], p["outputs"], p["num_pad"]
        assert len(lst) == num
        rows, group_sizes = [], []
        for sub in lst:
            group_sizes.append(len(sub))
            for op_name, contents in sub:
                shp = list(map(float, shape_dict[op_name]))
                assert len(contents) == self.length
                rows.append(shp + list(map(float, contents)))
        Ntot = len(rows)
        Np = max(_ru(max(Ntot, 1), SUB), SUB)
        X = np.zeros((Np, LANE), np.float32)
        if rows:
            arr = np.asarray(rows, np.float32)
            X[:Ntot, :arr.shape[1]] = arr
        S = np.zeros((num_pad, Np), np.float32)
        off = 0
        for g, sz in enumerate(group_sizes):
            S[g, off:off + sz] = 1.0
            off += sz

        meta = jnp.asarray([outputs], dtype=jnp.int32)
        probs_full = sard_fused_pallas(meta, jnp.asarray(X), jnp.asarray(S),
                                       p["Wa"], p["ba"], p["Wr"], p["br"],
                                       p["Wc"], p["bc"], p["Wfc3"], p["bfc"])
        probs = probs_full[0, :outputs]
        if sampling:
            probs = gumbel_softmax(jnp.log(probs + 1e-20), key)
        choice = jnp.argmax(probs)
        return probs, choice

    # -- module-level dispatch ------------------------------------------------
    def _split(self, bank, candidates, extents, feature, shape, random, sampling, key):
        assert len(candidates) == self.dim
        if random:
            # RASD path: random softmax over factor list per dim
            keys = jax.random.split(key, self.dim)
            factors_per_head = [get_factor_lst(int(extents[i])) for i in range(self.dim)]
            value_lst = [jax.nn.softmax(jax.random.uniform(keys[i],
                                                           (len(factors_per_head[i]),)))
                         for i in range(self.dim)]
            idx = jax.device_get(jnp.stack([jnp.argmax(v) for v in value_lst]))
            choice_lst = [factors_per_head[i][int(idx[i])] for i in range(self.dim)]
            return choice_lst, value_lst
        return self._sasd_batched_forward(bank, candidates, extents, feature, shape,
                                          sampling, key)

    def _reorder_or_parallel(self, id, candidates, extents, feature, shape,
                             random, sampling, key, mode=0):
        if random:
            outs = self.rard_outputs[id]
            vals = jax.nn.softmax(jax.random.uniform(key, (outs,)))
            return jnp.argmax(vals), vals
        name_feature_dict = {}
        for name, value in extents.items():
            lst = feature[name]
            name_feature_dict[name] = []
            for op_name, contents in lst:
                tmp = list(contents)
                if mode == 0:
                    tmp[1] *= tmp[0] / value
                    tmp[2] *= tmp[0] / value
                    tmp[0] = value
                elif mode == 1:
                    tmp[0] = value
                else:
                    raise ValueError("mode should in {0, 1}")
                name_feature_dict[name].append((op_name, tmp))
        lst = [name_feature_dict[name] for name in candidates]
        logits, choice = self._sard_forward(self.sard[id], lst, shape, sampling, key)
        return choice, logits

    def forward(self, type_key, candidates, extents, feature, shape,
                random=False, sampling=True, key=None):
        key = jax.random.PRNGKey(0) if key is None else key
        if type_key == "spatial":
            return self._split(self.sasd_spatial, candidates, extents, feature, shape,
                               random, sampling, key)
        elif type_key == "parallel":
            return self._reorder_or_parallel(3, candidates, extents, feature, shape,
                                             random, sampling, key, mode=0)
        elif type_key == "reduce":
            return self._split(self.sasd_reduce, candidates, extents, feature, shape,
                               random, sampling, key)
        elif type_key == "reorder_one":
            return self._reorder_or_parallel(0, candidates, extents, feature, shape,
                                             random, sampling, key, mode=0)
        elif type_key == "reorder_two":
            return self._reorder_or_parallel(1, candidates, extents, feature, shape,
                                             random, sampling, key, mode=0)
        elif type_key == "reorder_three":
            return self._reorder_or_parallel(2, candidates, extents, feature, shape,
                                             random, sampling, key, mode=1)
        else:
            raise ValueError("Not support type: {}".format(type_key))


# ----------------------------------------------------------------------------
if __name__ == "__main__":
    master = jax.random.PRNGKey(0)
    pkey, rkey = jax.random.split(master)

    length, hidden = 8, 32
    model = OpScheduleCPUd5(length, hidden, pkey)

    candidates = [f"axis{i}" for i in range(DIM)]
    shape_dict = {
        "opA": [4.0, 4.0, 16.0, 16.0, 3.0],
        "opB": [2.0, 8.0, 8.0, 32.0, 1.0],
    }
    feature = {}
    for i, name in enumerate(candidates):
        feature[name] = [
            ("opA", [float((i + j) % 5 + 1) for j in range(length)]),
            ("opB", [float((2 * i + j) % 7 + 1) for j in range(length)]),
        ]
    extents_spatial = [4, 8, 12, 16, 6]
    extents_dict = {name: float(i + 2) for i, name in enumerate(candidates)}

    k1, k2, k3 = jax.random.split(rkey, 3)

    # spatial split: one batched SASD Pallas launch for all 5 heads (no sampling)
    choices_s, values_s = model.forward("spatial", candidates, extents_spatial,
                                        feature, shape_dict, random=False,
                                        sampling=False, key=k1)
    # parallel: fused SARD (sapd) feature + streamed-Wfc fc softmax, gumbel glue
    choice_p, logits_p = model.forward("parallel", candidates, extents_dict,
                                       feature, shape_dict, random=False,
                                       sampling=True, key=k2)
    # reduce split via the random (RASD-equivalent) path
    choices_r, values_r = model.forward("reduce", candidates, extents_spatial,
                                        feature, shape_dict, random=True,
                                        sampling=False, key=k3)

    for v in values_s:
        jax.block_until_ready(v)
    jax.block_until_ready(logits_p)
    jax.block_until_ready(choice_p)
    for v in values_r:
        jax.block_until_ready(v)

    print("KERNEL_OK")
</pallas_src>

<mosaic_0001>
module attributes {stable_mosaic.version = 11 : i64} {
  func.func @_sasd_kernel(%arg0: i32, %arg1: memref<5x2xi32, #tpu.memory_space<smem>>, %arg2: memref<1x8x128xbf16, #tpu.memory_space<vmem>>, %arg3: memref<1x128x128xbf16, #tpu.memory_space<vmem>>, %arg4: memref<1x1x128xf32, #tpu.memory_space<vmem>>, %arg5: memref<1x128x128xbf16, #tpu.memory_space<vmem>>, %arg6: memref<1x128x128xbf16, #tpu.memory_space<vmem>>, %arg7: memref<1x1x128xf32, #tpu.memory_space<vmem>>, %arg8: memref<1x1x128xf32, #tpu.memory_space<vmem>>) attributes {dimension_semantics = [#tpu.dimension_semantics<parallel>], iteration_bounds = array<i64: 5>, scalar_prefetch = 1 : i64, scratch_operands = 0 : i64, tpu.core_type = #tpu.core_type<tc>, window_params = [{transform_indices = @transform_0, window_bounds = array<i64: 1, 8, 128>}, {transform_indices = @transform_1, window_bounds = array<i64: 1, 128, 128>}, {transform_indices = @transform_2, window_bounds = array<i64: 1, 1, 128>}, {transform_indices = @transform_3, window_bounds = array<i64: 1, 128, 128>}, {transform_indices = @transform_4, window_bounds = array<i64: 1, 128, 128>}, {transform_indices = @transform_5, window_bounds = array<i64: 1, 1, 128>}, {transform_indices = @transform_6, window_bounds = array<i64: 1, 1, 128>}]} {
    %0 = arith.index_cast %arg0 : i32 to index
    %c0 = arith.constant 0 : index
    %1 = memref.load %arg1[%0, %c0] : memref<5x2xi32, #tpu.memory_space<smem>>
    %2 = arith.index_cast %arg0 : i32 to index
    %c1 = arith.constant 1 : index
    %3 = memref.load %arg1[%2, %c1] : memref<5x2xi32, #tpu.memory_space<smem>>
    %c0_0 = arith.constant 0 : index
    %c0_1 = arith.constant 0 : index
    %c0_2 = arith.constant 0 : index
    %4 = vector.load %arg2[%c0_0, %c0_1, %c0_2] : memref<1x8x128xbf16, #tpu.memory_space<vmem>>, vector<1x8x128xbf16>
    %5 = vector.shape_cast %4 : vector<1x8x128xbf16> to vector<8x128xbf16>
    %c0_3 = arith.constant 0 : index
    %c0_4 = arith.constant 0 : index
    %c0_5 = arith.constant 0 : index
    %6 = vector.load %arg3[%c0_3, %c0_4, %c0_5] : memref<1x128x128xbf16, #tpu.memory_space<vmem>>, vector<1x128x128xbf16>
    %7 = vector.shape_cast %6 : vector<1x128x128xbf16> to vector<128x128xbf16>
    %cst = arith.constant dense<0.000000e+00> : vector<8x128xf32>
    %8 = tpu.matmul %5, %7, %cst {dimension_numbers = #tpu.dot_dimension_numbers<[1], [0], [0], [1], [0, 0, 1, 1], [], []>} : vector<8x128xbf16>, vector<128x128xbf16>, vector<8x128xf32> -> vector<8x128xf32>
    %c0_6 = arith.constant 0 : index
    %c0_7 = arith.constant 0 : index
    %c0_8 = arith.constant 0 : index
    %9 = vector.load %arg4[%c0_6, %c0_7, %c0_8] : memref<1x1x128xf32, #tpu.memory_space<vmem>>, vector<1x1x128xf32>
    %10 = vector.shape_cast %9 : vector<1x1x128xf32> to vector<1x128xf32>
    %11 = vector.broadcast %10 : vector<1x128xf32> to vector<8x128xf32>
    %12 = arith.addf %8, %11 : vector<8x128xf32>
    %13 = math.tanh %12 : vector<8x128xf32>
    %14 = tpu.iota {dimensions = array<i32: 0>} : vector<8x128xi32>
    %15 = vector.broadcast %1 : i32 to vector<8x128xi32>
    %16 = arith.cmpi slt, %14, %15 : vector<8x128xi32>
    %cst_9 = arith.constant 0.000000e+00 : f32
    %17 = vector.broadcast %cst_9 : f32 to vector<8x128xf32>
    %18 = arith.select %16, %13, %17 : vector<8x128xi1>, vector<8x128xf32>
    %cst_10 = arith.constant dense<0.000000e+00> : vector<128xf32>
    %19 = vector.multi_reduction <add>, %18, %cst_10 [0] : vector<8x128xf32> to vector<128xf32>
    %20 = vector.shape_cast %19 : vector<128xf32> to vector<1x128xf32>
    %c0_11 = arith.constant 0 : index
    %c0_12 = arith.constant 0 : index
    %c0_13 = arith.constant 0 : index
    %21 = vector.load %arg5[%c0_11, %c0_12, %c0_13] : memref<1x128x128xbf16, #tpu.memory_space<vmem>>, vector<1x128x128xbf16>
    %22 = vector.shape_cast %21 : vector<1x128x128xbf16> to vector<128x128xbf16>
    %c0_14 = arith.constant 0 : index
    %c0_15 = arith.constant 0 : index
    %c0_16 = arith.constant 0 : index
    %23 = vector.load %arg6[%c0_14, %c0_15, %c0_16] : memref<1x128x128xbf16, #tpu.memory_space<vmem>>, vector<1x128x128xbf16>
    %24 = vector.shape_cast %23 : vector<1x128x128xbf16> to vector<128x128xbf16>
    %cst_17 = arith.constant dense<0.000000e+00> : vector<128x128xf32>
    %25 = tpu.matmul %22, %24, %cst_17 {dimension_numbers = #tpu.dot_dimension_numbers<[1], [0], [0], [1], [0, 0, 1, 1], [], []>} : vector<128x128xbf16>, vector<128x128xbf16>, vector<128x128xf32> -> vector<128x128xf32>
    %c0_18 = arith.constant 0 : index
    %c0_19 = arith.constant 0 : index
    %c0_20 = arith.constant 0 : index
    %26 = vector.load %arg7[%c0_18, %c0_19, %c0_20] : memref<1x1x128xf32, #tpu.memory_space<vmem>>, vector<1x1x128xf32>
    %27 = vector.shape_cast %26 : vector<1x1x128xf32> to vector<1x128xf32>
    %28 = vector.broadcast %27 : vector<1x128xf32> to vector<128x128xf32>
    %29 = arith.addf %25, %28 : vector<128x128xf32>
    %30 = math.tanh %29 : vector<128x128xf32>
    %cst_21 = arith.constant dense<0.000000e+00> : vector<1x128xf32>
    %31 = tpu.matmul %20, %30, %cst_21 {dimension_numbers = #tpu.dot_dimension_numbers<[1], [1], [0], [0], [0, 0, 1, 0], [], []>} : vector<1x128xf32>, vector<128x128xf32>, vector<1x128xf32> -> vector<1x128xf32>
    %32 = tpu.iota {dimensions = array<i32: 1>} : vector<1x128xi32>
    %33 = vector.broadcast %3 : i32 to vector<1x128xi32>
    %34 = arith.cmpi slt, %32, %33 : vector<1x128xi32>
    %cst_22 = arith.constant 0xFF800000 : f32
    %35 = vector.broadcast %cst_22 : f32 to vector<1x128xf32>
    %36 = arith.select %34, %31, %35 : vector<1x128xi1>, vector<1x128xf32>
    %cst_23 = arith.constant dense<0xFF800000> : vector<1xf32>
    %37 = vector.multi_reduction <maximumf>, %36, %cst_23 [1] : vector<1x128xf32> to vector<1xf32>
    %38 = vector.shape_cast %37 : vector<1xf32> to vector<1x1xf32>
    %39 = vector.broadcast %38 : vector<1x1xf32> to vector<1x128xf32>
    %40 = arith.subf %36, %39 : vector<1x128xf32>
    %41 = math.exp %40 : vector<1x128xf32>
    %cst_24 = arith.constant 0.000000e+00 : f32
    %42 = vector.broadcast %cst_24 : f32 to vector<1x128xf32>
    %43 = arith.select %34, %41, %42 : vector<1x128xi1>, vector<1x128xf32>
    %cst_25 = arith.constant dense<0.000000e+00> : vector<1xf32>
    %44 = vector.multi_reduction <add>, %43, %cst_25 [1] : vector<1x128xf32> to vector<1xf32>
    %45 = vector.shape_cast %44 : vector<1xf32> to vector<1x1xf32>
    %46 = vector.broadcast %45 : vector<1x1xf32> to vector<1x128xf32>
    %47 = arith.divf %43, %46 : vector<1x128xf32>
    %c0_26 = arith.constant 0 : index
    %c0_27 = arith.constant 0 : index
    %c0_28 = arith.constant 0 : index
    %48 = vector.load %arg8[%c0_26, %c0_27, %c0_28] : memref<1x1x128xf32, #tpu.memory_space<vmem>>, vector<1x1x128xf32>
    %49 = vector.shape_cast %48 : vector<1x1x128xf32> to vector<1x128xf32>
    %50 = vector.shape_cast %47 : vector<1x128xf32> to vector<1x1x128xf32>
    tpu.vector_store %arg8[%c0_26, %c0_27, %c0_28], %50 {strides = array<i32>} : memref<1x1x128xf32, #tpu.memory_space<vmem>>, vector<1x1x128xf32>,
    return
  }
  func.func @transform_0(%arg0: i32, %arg1: memref<5x2xi32, #tpu.memory_space<smem>>) -> (i32, i32, i32) {
    %c0_i32 = arith.constant 0 : i32
    %c0_i32_0 = arith.constant 0 : i32
    %c0_i32_1 = arith.constant 0 : i32
    return %arg0, %c0_i32, %c0_i32_0 : i32, i32, i32
  }
  func.func @transform_1(%arg0: i32, %arg1: memref<5x2xi32, #tpu.memory_space<smem>>) -> (i32, i32, i32) {
    %c0_i32 = arith.constant 0 : i32
    %c0_i32_0 = arith.constant 0 : i32
    %c0_i32_1 = arith.constant 0 : i32
    return %arg0, %c0_i32, %c0_i32_0 : i32, i32, i32
  }
  func.func @transform_2(%arg0: i32, %arg1: memref<5x2xi32, #tpu.memory_space<smem>>) -> (i32, i32, i32) {
    %c0_i32 = arith.constant 0 : i32
    %c0_i32_0 = arith.constant 0 : i32
    %c0_i32_1 = arith.constant 0 : i32
    return %arg0, %c0_i32, %c0_i32_0 : i32, i32, i32
  }
  func.func @transform_3(%arg0: i32, %arg1: memref<5x2xi32, #tpu.memory_space<smem>>) -> (i32, i32, i32) {
    %c0_i32 = arith.constant 0 : i32
    %c0_i32_0 = arith.constant 0 : i32
    %c0_i32_1 = arith.constant 0 : i32
    return %arg0, %c0_i32, %c0_i32_0 : i32, i32, i32
  }
  func.func @transform_4(%arg0: i32, %arg1: memref<5x2xi32, #tpu.memory_space<smem>>) -> (i32, i32, i32) {
    %c0_i32 = arith.constant 0 : i32
    %c0_i32_0 = arith.constant 0 : i32
    %c0_i32_1 = arith.constant 0 : i32
    return %arg0, %c0_i32, %c0_i32_0 : i32, i32, i32
  }
  func.func @transform_5(%arg0: i32, %arg1: memref<5x2xi32, #tpu.memory_space<smem>>) -> (i32, i32, i32) {
    %c0_i32 = arith.constant 0 : i32
    %c0_i32_0 = arith.constant 0 : i32
    %c0_i32_1 = arith.constant 0 : i32
    return %arg0, %c0_i32, %c0_i32_0 : i32, i32, i32
  }
  func.func @transform_6(%arg0: i32, %arg1: memref<5x2xi32, #tpu.memory_space<smem>>) -> (i32, i32, i32) {
    %c0_i32 = arith.constant 0 : i32
    %c0_i32_0 = arith.constant 0 : i32
    %c0_i32_1 = arith.constant 0 : i32
    return %arg0, %c0_i32, %c0_i32_0 : i32, i32, i32
  }
}

</mosaic_0001>

<bundles_post_ra>
// kernel: sasd_batched_pallas.1
= control target key start
LH: loop header
LB: loop body
LE: loop exit
PB: predicated region body
PF: predicated region fallthrough
CT: control target
= control target key end

     0   :  { %s1984_s0 = inlined_call_operand.vmem [shape: s32[5,2], index: 0, kind: input, shape index: {}]   ;;  %s1985_s1 = inlined_call_operand.hbm [shape: bf16[5,8,128], index: 1, kind: input, shape index: {}]   ;;  %s1986_s2 = inlined_call_operand.hbm [shape: bf16[5,128,128], index: 2, kind: input, shape index: {}]   ;;  %s1987_s3 = inlined_call_operand.vmem [shape: f32[5,1,128], index: 3, kind: input, shape index: {}]   ;;  %s1988_s4 = inlined_call_operand.hbm [shape: bf16[5,128,128], index: 4, kind: input, shape index: {}]   ;;  %s1989_s5 = inlined_call_operand.hbm [shape: bf16[5,128,128], index: 5, kind: input, shape index: {}]   ;;  %s1990_s6 = inlined_call_operand.vmem [shape: f32[5,1,128], index: 6, kind: input, shape index: {}]   ;;  %s1991_s7 = inlined_call_operand.hbm [shape: f32[5,1,128], index: 7, kind: output, shape index: {}]  }
   0x1   :  { %2004 = sst [smem:[#allocation22_spill]] %s1986_s2  ;;  %s12_s26 = sshll.u32 %s1984_s0, 4  ;;  %s13_s26 = int_to_ptr.vmem [resolvable:$true] %s12_s26 }
   0x2   :  { %s1381_s27 = scalar_lea.vmem %s13_s26, 128  ;;  %p1386_p1 = scmp.lt.s32.totalorder %s13_s26, %s13_s26 }
   0x3   :  { %p1382_p0 = scmp.ne.s32.totalorder %s13_s26, %s1381_s27  ;;  %p1387_p2 = scmp.lt.s32.totalorder %s1381_s27, %s1381_s27 }
   0x5   :  { %p1388_p3 = por %p1387_p2, %p1386_p1 }
   0x7   :  { %p1389_p4 = pnand %p1388_p3, %p1382_p0 }
   0x9   :  { %1392 = shalt.err (!%p1389_p4)  }
   0xa   :  { %s1591_s28 = smov [#allocation3]  }
   0xb   :  { %15 = dma.vmem_to_smem %s13_s26, 128, %s1591_s28, [#allocation2] }
   0xc   :  { %1557 = dma.done.wait [#allocation2], 128 }
   0xd   :  { %1558 = vsyncadd [#allocation2], 4294967168 }
   0xe   :  { %17 = sfence }
   0xf   :  { %18 = vsyncpa [#allocation5], 0 }
  0x10   :  { %20 = vsyncpa [#allocation5 + $0x1], 0 }
  0x11   :  { %21 = vsyncpa [#allocation8], 0 }
  0x12   :  { %23 = vsyncpa [#allocation8 + $0x1], 0 }
  0x13   :  { %24 = vsyncpa [#allocation11], 0 }
  0x14   :  { %26 = vsyncpa [#allocation11 + $0x1], 0 }
  0x15   :  { %27 = vsyncpa [#allocation6], 0 }
  0x16   :  { %29 = vsyncpa [#allocation6 + $0x1], 0  ;;  %s1645_s0 = smov 0   ;;  %s1647_s29 = smov 0  }
  0x17   :  { %s1649_s30 = smov 0   ;;  %s1651_s8 = smov 0  }
  0x18 LB: > { %2005 = sst [smem:[#allocation18_spill]] %s1585_s30  ;;  %s1666_s9 = sadd.s32 4294967295, %s1589_s8   ;;  %s1589_s8 = sphi %s1651_s8, %s2025_s8   ;;  %s1585_s30 = sphi %s1649_s30, %s2027_s30   ;;  %s1581_s29 = sphi %s1647_s29, %s2029_s29   ;;  %s1577_s0 = sphi %s1645_s0, %s2028_s0  }
  0x19   : > { %s1047_s10 = sadd.s32 4294967294, %s1589_s8   ;;  %s1670_s11 = sadd.s32 1, %s1589_s8  }
  0x1a   : > { %2006 = sst [smem:[#allocation19_spill]] %s1670_s11  ;;  %s42_s12 = sadd.s32 1, %s1585_s30 }
  0x1b   : > { %s39_s13 = ssub.s32 %s1589_s8, %s1670_s11  ;;  %p49_p5 = scmp.ne.s32.totalorder %s1585_s30, %s1581_s29 }
  0x1c   : > { %p40_p6 = scmp.eq.s32.totalorder %s39_s13, 0  ;;  %p50_p7 = scmp.eq.s32.totalorder %s1589_s8, 0 }
  0x1d   : > { %p55_p8 = scmp.ne.s32.totalorder %s1581_s29, %s1577_s0  ;;  %p56_p9 = scmp.eq.s32.totalorder %s1666_s9, 0 }
  0x1e   : > { %s1682_s14 = scalar_select %p40_p6, %s1585_s30, %s42_s12  }
  0x1f   : > { %p51_p10 = por %p50_p7, %p49_p5  ;;  %p1684_p11 = por %p56_p9, %p55_p8 }
  0x20   : > { %2007 = sst [smem:[#allocation20_spill]] %s1682_s14  ;;  %p209_p12 = scmp.eq.s32.totalorder %s1666_s9, 4 }
  0x21   : > { %s2008_s15 = scalar_select %p1684_p11, 1, 0 }
  0x22   : > { %p215_p13 = scmp.eq.s32.totalorder %s1047_s10, 4  ;;  %p1279_p0 = scmp.lt.s32.totalorder %s1589_s8, 5 }
  0x23   : > { %p1690_p1 = por %p209_p12, %p49_p5  ;;  %s1699_s18 = sand.u32 1, %s1585_s30  }
  0x24   : > { %p1694_p2 = por %p215_p13, %p55_p8  ;;  %p1701_p3 = pnand %p1279_p0, %p51_p10 }
  0x25   : > { %s2009_s16 = scalar_select %p1690_p1, 1, 0 }
  0x26   : > { %s2010_s17 = scalar_select %p1694_p2, 1, 0 }
  0x27   : > { %s2012_s19 = scalar_select %p1701_p3, 1, 0 }
  0x28   : > { %2011 = sst [smem:[#allocation21_spill]] %s2010_s17  ;;  %s253_s20 = sand.u32 1, %s1589_s8  }
  0x29   : > { %s1707_s21 = sshll.u32 %s1699_s18, 6  ;;  %s1710_s22 = sshll.u32 %s1589_s8, 10 }
  0x2a   : > { %s2013_s2 = sld [smem:[#allocation22_spill]]  ;;  %s257_s26 = scalar_lea.vmem [#allocation7], %s1707_s21 }
  0x2b   : > { %s264_s27 = sshll.u32 %s257_s26, 4  ;;  %s1722_s28 = scalar_lea.sflag [#allocation8], %s253_s20  ;;  %s1719_s27 = int_to_ptr.vmem [resolvable:$true] %s264_s27 }
  0x2c   : > { %p1728_p6 = pneg %p1701_p3 }
  0x30   : > { %s1716_s25 = scalar_lea.hbm %s2013_s2, %s1710_s22  ;;  %s1398_s24 = scalar_lea.hbm %s2013_s2, 5120 }
  0x31   : > { %s1393_s10 = scalar_lea.hbm %s1716_s25, 1024  ;;  %p1399_p9 = scmp.lt.u32.totalorder %s1716_s25, %s2013_s2 }
  0x32   : > { %p1394_p5 = scmp.ne.s32.totalorder %s1716_s25, %s1393_s10  ;;  %p1400_p10 = scmp.lt.u32.totalorder %s1398_s24, %s1393_s10 }
  0x33   : > { %p1402_p13 = scmp.lt.u32.totalorder %s1393_s10, %s1716_s25 }
  0x34   : > { %p1396_p7 = pnand %p1728_p6, %p1394_p5  ;;  %p1401_p12 = por %p1400_p10, %p1399_p9 }
  0x36   : > { %p1397_p8 = pneg %p1396_p7  ;;  %p1403_p0 = por %p1402_p13, %p1401_p12 }
  0x38   : > { %p1404_p4 = pnand %p1403_p0, %p1397_p8 }
  0x3a   : > { %1407 = shalt.err (!%p1404_p4)
}
  0x3b   : > { %s1408_s20 = scalar_lea.vmem %s1719_s27, 1024  ;;  %s1592_s13 = smov [#allocation7]  }
  0x3c   : > { %p1409_p5 = scmp.ne.s32.totalorder %s1719_s27, %s1408_s20  ;;  %s1413_s23 = sshll.u32 %s1592_s13, 4  ;;  %s1414_s23 = int_to_ptr.vmem [resolvable:$false] %s1413_s23 }
  0x3d   : > { %s1415_s14 = scalar_lea.vmem %s1414_s23, 2048  ;;  %p1416_p1 = scmp.lt.s32.totalorder %s1719_s27, %s1414_s23 }
  0x3e   : > { %p1411_p7 = pnand %p1409_p5, %p1728_p6  ;;  %p1417_p11 = scmp.lt.s32.totalorder %s1415_s14, %s1408_s20 }
  0x40   : > { %p1412_p2 = pneg %p1411_p7  ;;  %p1418_p9 = por %p1417_p11, %p1416_p1 }
  0x42   : > { %p1419_p10 = pnand %p1418_p9, %p1412_p2 }
  0x44   : > { %1422 = shalt.err (!%p1419_p10)
}
  0x45   : > { %s1997_s10 = smov 64   ;;  %s1999_s24 = smov 4  }
  0x46   : > { %1268 = dma.hbm_to_vmem [thread:$0]  (!%p1701_p3), %s1716_s25, 1024, %s1719_s27, %s1722_s28, %s1997_s10, %s1997_s10, %s1999_s24  }
  0x47   : > { %p326_p11 = scmp.lt.s32.totalorder %s1589_s8, 6  ;;  %s1050_s26 = sshll.u32 %s1699_s18, 2 }
  0x48   : > { %s1051_s20 = sshll.u32 %s1589_s8, 6  ;;  %p2015_p1 = scmp.ge.s32.totalorder %s1589_s8, 1 }
  0x49   : > { %s1767_s2 = scalar_lea.hbm %s1985_s1, %s1051_s20  ;;  %s239_s30 = scalar_lea.vmem [#allocation4], %s1050_s26 }
  0x4a   : > { %p1760_p2 = pnand %p2015_p1, %p326_p11  ;;  %s246_s11 = sshll.u32 %s239_s30, 4  ;;  %s247_s11 = int_to_ptr.vmem [resolvable:$true] %s246_s11 }
  0x4b   : > { %s236_s25 = scalar_lea.sflag [#allocation5], %s1699_s18  ;;  %s1423_s27 = scalar_lea.hbm %s1767_s2, 64 }
  0x4c   : > { %s2016_s13 = scalar_select %p1760_p2, 1, 0 }
  0x4d   : > { %p1424_p4 = scmp.ne.s32.totalorder %s1767_s2, %s1423_s27  ;;  %s1428_s17 = scalar_lea.hbm %s1985_s1, 320 }
  0x4e   : > { %p1429_p13 = scmp.lt.u32.totalorder %s1767_s2, %s1985_s1  ;;  %p1430_p0 = scmp.lt.u32.totalorder %s1428_s17, %s1423_s27 }
  0x4f   : > { %p1426_p8 = pnand %p1424_p4, %p1728_p6  ;;  %p1432_p7 = scmp.lt.u32.totalorder %s1423_s27, %s1767_s2 }
  0x50   : > { %p1431_p5 = por %p1430_p0, %p1429_p13 }
  0x51   : > { %p1427_p12 = pneg %p1426_p8 }
  0x52   : > { %p1433_p9 = por %p1432_p7, %p1431_p5 }
  0x54   : > { %p1434_p10 = pnand %p1433_p9, %p1427_p12 }
  0x56   : > { %1437 = shalt.err (!%p1434_p10)
}
  0x57   : > { %s1438_s30 = scalar_lea.vmem %s247_s11, 64  ;;  %s1595_s26 = smov [#allocation4]  }
  0x58   : > { %p1439_p11 = scmp.ne.s32.totalorder %s247_s11, %s1438_s30  ;;  %s1443_s14 = sshll.u32 %s1595_s26, 4  ;;  %s1444_s14 = int_to_ptr.vmem [resolvable:$false] %s1443_s14 }
  0x59   : > { %s1445_s10 = scalar_lea.vmem %s1444_s14, 128  ;;  %p1446_p8 = scmp.lt.s32.totalorder %s247_s11, %s1444_s14 }
  0x5a   : > { %p1441_p1 = pnand %p1439_p11, %p1728_p6  ;;  %p1447_p2 = scmp.lt.s32.totalorder %s1445_s10, %s1438_s30 }
  0x5c   : > { %p1442_p4 = pneg %p1441_p1  ;;  %p1448_p3 = por %p1447_p2, %p1446_p8 }
  0x5e   : > { %p1449_p0 = pnand %p1448_p3, %p1442_p4 }
  0x60   : > { %1452 = shalt.err (!%p1449_p0)
}
  0x61   : > { %p2017_p13 = scmp.ne.s32.totalorder %s2012_s19, 0  ;;  %s1791_s27 = scalar_lea.hbm %s1988_s4, %s1710_s22 }
  0x62   : > { %s284_s23 = scalar_lea.vmem [#allocation9], %s1707_s21  ;;  %s1453_s30 = scalar_lea.hbm %s1791_s27, 1024 }
  0x63   : > { %1265 = dma.hbm_to_vmem [thread:$0]  (!%p2017_p13), %s1767_s2, 64, %s247_s11, %s236_s25  }
  0x64   : > { %s291_s20 = sshll.u32 %s284_s23, 4  ;;  %p1454_p3 = scmp.ne.s32.totalorder %s1791_s27, %s1453_s30  ;;  %s1794_s20 = int_to_ptr.vmem [resolvable:$true] %s291_s20 }
  0x65   : > { %s1458_s11 = scalar_lea.hbm %s1988_s4, 5120  ;;  %p1459_p5 = scmp.lt.u32.totalorder %s1791_s27, %s1988_s4 }
  0x66   : > { %p1456_p2 = pnand %p1454_p3, %p1728_p6  ;;  %p1460_p7 = scmp.lt.u32.totalorder %s1458_s11, %s1453_s30 }
  0x67   : > { %p1462_p10 = scmp.lt.u32.totalorder %s1453_s30, %s1791_s27 }
  0x68   : > { %p1457_p12 = pneg %p1456_p2  ;;  %p1461_p9 = por %p1460_p7, %p1459_p5 }
  0x6a   : > { %p1463_p11 = por %p1462_p10, %p1461_p9 }
  0x6c   : > { %p1464_p1 = pnand %p1463_p11, %p1457_p12 }
  0x6e   : > { %1467 = shalt.err (!%p1464_p1)
}
  0x6f   : > { %s1468_s10 = scalar_lea.vmem %s1794_s20, 1024  ;;  %s1596_s17 = smov [#allocation9]  }
  0x70   : > { %p1469_p4 = scmp.ne.s32.totalorder %s1794_s20, %s1468_s10  ;;  %s1473_s24 = sshll.u32 %s1596_s17, 4  ;;  %s1474_s24 = int_to_ptr.vmem [resolvable:$false] %s1473_s24 }
  0x71   : > { %s1475_s23 = scalar_lea.vmem %s1474_s24, 2048  ;;  %p1476_p3 = scmp.lt.s32.totalorder %s1794_s20, %s1474_s24 }
  0x72   : > { %p1471_p8 = pnand %p1469_p4, %p1728_p6  ;;  %p1477_p2 = scmp.lt.s32.totalorder %s1475_s23, %s1468_s10 }
  0x74   : > { %p1472_p0 = pneg %p1471_p8  ;;  %p1478_p5 = por %p1477_p2, %p1476_p3 }
  0x76   : > { %p1479_p7 = pnand %p1478_p5, %p1472_p0 }
  0x78   : > { %1482 = shalt.err (!%p1479_p7)
}
  0x79   : > { %s2018_s30 = smov 4   ;;  %s2019_s26 = smov 64  }
  0x7a   : > { %1271 = dma.hbm_to_vmem [thread:$0]  (!%p2017_p13), %s1791_s27, 1024, %s1794_s20, %s1722_s28, %s2019_s26, %s2019_s26, %s2018_s30  }
  0x7b   : > { %s1825_s25 = scalar_lea.hbm %s1989_s5, %s1710_s22  ;;  %s305_s14 = scalar_lea.vmem [#allocation10], %s1707_s21 }
  0x7c   : > { %s312_s10 = sshll.u32 %s305_s14, 4  ;;  %s302_s17 = scalar_lea.sflag [#allocation11], %s1699_s18  ;;  %s1828_s10 = int_to_ptr.vmem [resolvable:$true] %s312_s10 }
  0x7d   : > { %s1483_s24 = scalar_lea.hbm %s1825_s25, 1024  ;;  %s1488_s20 = scalar_lea.hbm %s1989_s5, 5120 }
  0x7e   : > { %p1484_p12 = scmp.ne.s32.totalorder %s1825_s25, %s1483_s24  ;;  %p1489_p11 = scmp.lt.u32.totalorder %s1825_s25, %s1989_s5 }
  0x7f   : > { %p1490_p1 = scmp.lt.u32.totalorder %s1488_s20, %s1483_s24  ;;  %p1492_p8 = scmp.lt.u32.totalorder %s1483_s24, %s1825_s25 }
  0x80   : > { %p1486_p9 = pnand %p1484_p12, %p1728_p6 }
  0x81   : > { %p1491_p4 = por %p1490_p1, %p1489_p11 }
  0x82   : > { %p1487_p10 = pneg %p1486_p9 }
  0x83   : > { %p1493_p0 = por %p1492_p8, %p1491_p4 }
  0x85   : > { %p1494_p3 = pnand %p1493_p0, %p1487_p10 }
  0x87   : > { %1497 = shalt.err (!%p1494_p3)
}
  0x88   : > { %s1498_s21 = scalar_lea.vmem %s1828_s10, 1024  ;;  %s1597_s2 = smov [#allocation10]  }
  0x89   : > { %p1499_p2 = scmp.ne.s32.totalorder %s1828_s10, %s1498_s21  ;;  %s1503_s11 = sshll.u32 %s1597_s2, 4  ;;  %s1504_s11 = int_to_ptr.vmem [resolvable:$false] %s1503_s11 }
  0x8a   : > { %s1505_s14 = scalar_lea.vmem %s1504_s11, 2048  ;;  %p1506_p12 = scmp.lt.s32.totalorder %s1828_s10, %s1504_s11 }
  0x8b   : > { %p1501_p5 = pnand %p1499_p2, %p1728_p6  ;;  %p1507_p9 = scmp.lt.s32.totalorder %s1505_s14, %s1498_s21 }
  0x8d   : > { %p1502_p7 = pneg %p1501_p5  ;;  %p1508_p11 = por %p1507_p9, %p1506_p12 }
  0x8f   : > { %p1509_p1 = pnand %p1508_p11, %p1502_p7 }
  0x91   : > { %1512 = shalt.err (!%p1509_p1)
}
  0x92   : > { %1274 = dma.hbm_to_vmem [thread:$0]  (!%p2017_p13), %s1825_s25, 1024, %s1828_s10, %s302_s17, %s2019_s26, %s2019_s26, %s2018_s30  }
  0x93   : > { %p2020_p6 = scmp.ne.s32.totalorder %s2016_s13, 0 }
  0x94   : > { %s1860_s12 = sand.u32 (!%p2020_p6), 1, %s1581_s29   ;;  %p2021_p10 = scmp.ne.s32.totalorder (!%p2020_p6), %s2008_s15, 0 }
  0x95   : > { %330 = sbr.rel (%p2020_p6) target bundleno = 1063 (0x427), region = 44  ;;  %s1062_s24 = sshll.u32 (!%p2020_p6), %s1860_s12, 2 }
  0x96   : > { %s333_s28 = scalar_lea.sflag (!%p2020_p6), [#allocation5], %s1860_s12  ;;  %s1864_s19 = scalar_lea.vmem (!%p2020_p6), [#allocation4], %s1062_s24 }
  0x9c   : > { %1560 = dma.done.wait (%p2021_p10), %s333_s28, 64  }
  0x9d   : > { %1562 = vsyncadd (%p2021_p10), %s333_s28, 4294967232  ;;  %s341_s18 = sand.u32 1, %s1666_s9   ;;  %s1063_s13 = sshll.u32 %s1860_s12, 6 }
  0x9e   : > { %s342_s30 = scalar_lea.sflag [#allocation8], %s341_s18  ;;  %s1872_s26 = scalar_lea.vmem [#allocation7], %s1063_s13 }
  0x9f   : > { %1564 = dma.done.wait (%p2021_p10), %s342_s30, 2048  }
  0xa0   : > { %1566 = vsyncadd (%p2021_p10), %s342_s30, 4294965248  ;;  %s1878_s25 = scalar_lea.vmem [#allocation9], %s1063_s13  ;;  %s360_s10 = scalar_lea.sflag [#allocation11], %s1860_s12 }
  0xa1   : > { %s1881_s17 = scalar_lea.vmem [#allocation10], %s1063_s13 }
  0xa2   : > { %1568 = dma.done.wait (%p2021_p10), %s360_s10, 1024  }
  0xa3   : > { %1570 = vsyncadd (%p2021_p10), %s360_s10, 4294966272  ;;  %v1598_v0 = vmov 0.0   ;;  %vm1599_vm0 = vmmov 0   ;;  %v1319_v1 = vld [vmem:[%s1872_s26] sm:$0xff]   ;;  %v1320_v2 = vld [vmem:[%s1872_s26 + $0x8] sm:$0xff]   ;;  %v1600_v26 = vmov 0.0|0.0  }
  0xa4   : > { %1141 = vmatprep.subr.bf16.mxu1 %v1598_v0  ;;  %1157 = vmatprep.mubr.msk.bf16.mxu1 %vm1599_vm0, %v1598_v0  ;;  %v1321_v3 = vld [vmem:[%s1872_s26 + $0x10] sm:$0xff]   ;;  %v1322_v4 = vld [vmem:[%s1872_s26 + $0x18] sm:$0xff]   ;;  %v1323_v5 = vld [vmem:[%s1872_s26 + $0x20] sm:$0xff]   ;;  %p412_p13 = scmp.lt.s32.totalorder %s1666_s9, 4  ;;  %s1066_s11 = sshll.u32 %s1666_s9, 7  ;;  %vm870_vm3 = vcmask 1040384  }
  0xa5   : > { %1225 = vmatprep.mubr.msk.f32.mxu0 %vm1599_vm0, %v1598_v0  ;;  %1142 = vmatpush3.bf16.msra.mxu1 %v1319_v1  ;;  %v1324_v6 = vld [vmem:[%s1872_s26 + $0x28] sm:$0xff]   ;;  %v1325_v7 = vld [vmem:[%s1872_s26 + $0x30] sm:$0xff]   ;;  %v1326_v8 = vld [vmem:[%s1872_s26 + $0x38] sm:$0xff]   ;;  %s420_s14 = sld [smem:[#allocation3 + %s1066_s11]]  ;;  %s421_s24 = sadd.s32 1, %s1066_s11 }
  0xa6   : > { %1143 = vmatprep.subr.bf16.mxu1 %v1598_v0  ;;  %v1327_v9 = vld [vmem:[%s1881_s17] sm:$0xff]   ;;  %v423_v10 = vld [vmem:[%s1864_s19] sm:$0xf]  ;;  %v1328_v12 = vld [vmem:[%s1881_s17 + $0x8] sm:$0xff]   ;;  %1228 = vmatprep.subr.bf16.mxu0 %v1600_v26  ;;  %s1917_s15 = scalar_select %p412_p13, %s1666_s9, 4 }
  0xa7   : > { %v1335_v11 = vld [vmem:[%s1878_s25] sm:$0xff]   ;;  %v1329_v13 = vld [vmem:[%s1881_s17 + $0x10] sm:$0xff]   ;;  %v1330_v14 = vld [vmem:[%s1881_s17 + $0x18] sm:$0xff]   ;;  %s422_s28 = sld [smem:[#allocation3 + %s421_s24]]  ;;  %s1093_s19 = sshll.u32 %s1666_s9, 4 }
  0xa8   : > { %v1331_v15 = vld [vmem:[%s1881_s17 + $0x20] sm:$0xff]   ;;  %v1332_v16 = vld [vmem:[%s1881_s17 + $0x28] sm:$0xff]   ;;  %v1333_v17 = vld [vmem:[%s1881_s17 + $0x30] sm:$0xff]   ;;  %s417_s22 = scalar_lea.vmem %s1990_s6, %s1917_s15  ;;  %s414_s2 = scalar_lea.vmem %s1987_s3, %s1917_s15 }
  0xa9   : > { %1144 = vmatpush3.bf16.msra.mxu1 %v1320_v2  ;;  %v1334_v18 = vld [vmem:[%s1881_s17 + $0x38] sm:$0xff]   ;;  %v1336_v19 = vld [vmem:[%s1878_s25 + $0x8] sm:$0xff]   ;;  %v1337_v20 = vld [vmem:[%s1878_s25 + $0x10] sm:$0xff]   ;;  %s411_s18 = scalar_lea.vmem [#allocation12], %s1860_s12  ;;  %s885_s10 = scalar_lea.sflag [#allocation6], %s1860_s12 }
  0xaa   : > { %1145 = vmatprep.subr.bf16.mxu1 %v1598_v0  ;;  %v1338_v21 = vld [vmem:[%s1878_s25 + $0x18] sm:$0xff]   ;;  %v1339_v22 = vld [vmem:[%s1878_s25 + $0x20] sm:$0xff]   ;;  %v1340_v23 = vld [vmem:[%s1878_s25 + $0x28] sm:$0xff]   ;;  %s897_s13 = sshll.u32 %s411_s18, 4  ;;  %p2022_p8 = scmp.ne.s32.totalorder %s2009_s16, 0  ;;  %s1943_s13 = int_to_ptr.vmem [resolvable:$true] %s897_s13 }
  0xab   : > { %v1341_v24 = vld [vmem:[%s1878_s25 + $0x30] sm:$0xff]   ;;  %v1342_v25 = vld [vmem:[%s1878_s25 + $0x38] sm:$0xff]   ;;  %s1941_s25 = scalar_lea.hbm %s1991_s7, %s1093_s19  ;;  %s1513_s17 = scalar_lea.vmem %s1943_s13, 16 }
  0xac   : > { %v1076_v31 = vld [vmem:[%s417_s22] ss:$0 sm:$0xff]  ;;  %p1514_p4 = scmp.ne.s32.totalorder %s1943_s13, %s1513_s17  ;;  %s1601_s9 = smov [#allocation12]  }
  0xad   : > { %1146 = vmatpush3.bf16.msra.mxu1 %v1321_v3  ;;  %s1517_s15 = sshll.u32 %s1601_s9, 4  ;;  %s1518_s15 = int_to_ptr.vmem [resolvable:$false] %s1517_s15 }
  0xae   : > { %1147 = vmatprep.subr.bf16.mxu1 %v1598_v0  ;;  %p1515_p0 = pnand %p1514_p4, %p2022_p8  ;;  %s1519_s27 = scalar_lea.vmem %s1518_s15, 32 }
  0xaf   : > { %p1520_p2 = scmp.lt.s32.totalorder %s1943_s13, %s1518_s15  ;;  %p1521_p5 = scmp.lt.s32.totalorder %s1519_s27, %s1513_s17 }
  0xb0   : > { %p1516_p3 = pneg %p1515_p0 }
  0xb1   : > { %1148 = vmatpush3.bf16.msra.mxu1 %v1322_v4  ;;  %p1522_p7 = por %p1521_p5, %p1520_p2 }
  0xb2   : > { %1149 = vmatprep.subr.bf16.mxu1 %v1598_v0 }
  0xb3   : > { %p1523_p12 = pnand %p1522_p7, %p1516_p3 }
  0xb5   : > { %1150 = vmatpush3.bf16.msra.mxu1 %v1323_v5 }
  0xb6   : > { %1151 = vmatprep.subr.bf16.mxu1 %v1598_v0 }
  0xb9   : > { %1152 = vmatpush3.bf16.msra.mxu1 %v1324_v6 }
  0xba   : > { %1153 = vmatprep.subr.bf16.mxu1 %v1598_v0 }
  0xbd   : > { %1154 = vmatpush3.bf16.msra.mxu1 %v1325_v7 }
  0xbe   : > { %1155 = vmatprep.subr.bf16.mxu1 %v1598_v0 }
  0xc1   : > { %1156 = vmatpush3.bf16.msra.mxu1 %v1326_v8 }
  0xc2   : > { %1161 = vmatprep.subr.bf16.mxu1 %v1327_v9 }
  0xc4   : > { %1158 = vmatmul.mubr.bf16.vlgmr.msra.gmra.mrb[0].mxu1 %v423_v10 }
  0xc5   : > { %1162 = vmatpush3.bf16.msra.mxu1 %v1327_v9  ;;  %1177 = vmatprep.mubr.bf16.mxu1 %v1335_v11 }
  0xc6   : > { %1163 = vmatprep.subr.bf16.mxu1 %v1328_v12 }
  0xc9   : > { %1164 = vmatpush3.bf16.msra.mxu1 %v1328_v12 }
  0xca   : > { %1165 = vmatprep.subr.bf16.mxu1 %v1329_v13 }
  0xcd   : > { %1166 = vmatpush3.bf16.msra.mxu1 %v1329_v13 }
  0xce   : > { %1167 = vmatprep.subr.bf16.mxu1 %v1330_v14 }
  0xd1   : > { %1168 = vmatpush3.bf16.msra.mxu1 %v1330_v14 }
  0xd2   : > { %1169 = vmatprep.subr.bf16.mxu1 %v1331_v15 }
  0xd5   : > { %1170 = vmatpush3.bf16.msra.mxu1 %v1331_v15 }
  0xd6   : > { %1171 = vmatprep.subr.bf16.mxu1 %v1332_v16 }
  0xd9   : > { %1172 = vmatpush3.bf16.msra.mxu1 %v1332_v16 }
  0xda   : > { %1173 = vmatprep.subr.bf16.mxu1 %v1333_v17 }
  0xdd   : > { %1174 = vmatpush3.bf16.msra.mxu1 %v1333_v17 }
  0xde   : > { %1175 = vmatprep.subr.bf16.mxu1 %v1334_v18 }
  0xe1   : > { %1176 = vmatpush3.bf16.msra.mxu1 %v1334_v18 }
  0xe4   : > { %1178 = vmatmul.mubr.bf16.vlgmr.msra.gmra.mrb[4].mxu1 %v1336_v19  ;;  %v1067_v19 = vld [vmem:[%s414_s2] ss:$0 sm:$0xff] }
  0xe5   : > { %1181 = vmatprep.mubr.bf16.mxu1 %v1337_v20 }
  0xec   : > { %1182 = vmatmul.mubr.bf16.gmra.mrb[8].mxu1 %v1338_v21 }
  0xed   : > { %1185 = vmatprep.mubr.bf16.mxu1 %v1339_v22 }
  0xf4   : > { %1186 = vmatmul.mubr.bf16.gmra.mrb[12].mxu1 %v1340_v23 }
  0xf5   : > { %1189 = vmatprep.mubr.bf16.mxu1 %v1341_v24 }
  0xfc   : > { %1190 = vmatmul.mubr.bf16.gmra.mrb[16].mxu1 %v1342_v25 }
 0x197   : > { %v1913_v27 = vpop.f32.mrb[0].mxu1 }
 0x198   : > { %v1159_v28 = vpop.f32.mrb[1].mxu1  ;;  %v530_v23 = vadd.f32 %v1067_v19, %v1913_v27 }
 0x199   : > { %v532_v29 = vpop.f32.mrb[2].mxu1  ;;  %v536_v28 = vlaneseq }
 0x19a   : > { %v1160_v30 = vpop.f32.mrb[3].mxu1 }
 0x19b   : > { %v537_v29 = vshrl.u32 %v536_v28, 7  ;;  %v538_v30 = vstv %s420_s14 }
 0x19d   : > { %vm539_vm1 = vcmp.lt.s32.totalorder %v537_v29, %v538_v30 }
 0x1b7   : > { %v1179_v32 = vpop.f32.mrb[4].mxu1 }
 0x1b8   : > { %v725_v33 = vadd.f32 %v1179_v32, %v1076_v31  ;;  %v716_v34 = vpop.f32.mrb[5].mxu1 }
 0x1b9   : > { %v717_v35 = vadd.f32 %v1076_v31, %v716_v34  ;;  %v1180_v36 = vpop.f32.mrb[6].mxu1 }
 0x1ba   : > { %1343 = vtanh.f32 %v725_v33  ;;  %v728_v37 = vadd.f32 %v1180_v36, %v1076_v31  ;;  %v719_v38 = vpop.f32.mrb[7].mxu1 }
 0x1bb   : > { %1345 = vtanh.f32 %v717_v35  ;;  %v720_v39 = vadd.f32 %v1076_v31, %v719_v38  ;;  %v866_v38 = vand.u32 127, %v536_v28 }
 0x1bc   : > { %1347 = vtanh.f32 %v728_v37 }
 0x1bd   : > { %1349 = vtanh.f32 %v720_v39  ;;  %v867_v39 = vstv %s422_s28 }
 0x1be   : > { %vm868_vm2 = vcmp.lt.s32.totalorder %v866_v38, %v867_v39 }
 0x1bf   : > { %v1183_v40 = vpop.f32.mrb[8].mxu1 }
 0x1c0   : > { %v741_v41 = vadd.f32 %v1183_v40, %v1076_v31  ;;  %v732_v42 = vpop.f32.mrb[9].mxu1 }
 0x1c1   : > { %v733_v43 = vadd.f32 %v1076_v31, %v732_v42  ;;  %v1184_v44 = vpop.f32.mrb[10].mxu1 }
 0x1c2   : > { %1351 = vtanh.f32 %v741_v41  ;;  %v744_v45 = vadd.f32 %v1184_v44, %v1076_v31  ;;  %v735_v46 = vpop.f32.mrb[11].mxu1 }
 0x1c3   : > { %1353 = vtanh.f32 %v733_v43  ;;  %v736_v47 = vadd.f32 %v1076_v31, %v735_v46 }
 0x1c4   : > { %v1344_v48 = vpop.eup %1343  ;;  %1355 = vtanh.f32 %v744_v45 }
 0x1c5   : > { %v1346_v49 = vpop.eup %1345  ;;  %1357 = vtanh.f32 %v736_v47 }
 0x1c6   : > { %v1348_v50 = vpop.eup %1347 }
 0x1c7   : > { %v1350_v51 = vpop.eup %1349  ;;  %v1232_v52 = vpack.c.bf16 %v1348_v50, %v1344_v48  ;;  %v1187_v53 = vpop.f32.mrb[12].mxu1 }
 0x1c8   : > { %v1229_v54 = vpack.c.bf16 %v1350_v51, %v1346_v49  ;;  %v757_v55 = vadd.f32 %v1187_v53, %v1076_v31  ;;  %v748_v56 = vpop.f32.mrb[13].mxu1 }
 0x1c9   : > { %v749_v57 = vadd.f32 %v1076_v31, %v748_v56  ;;  %v1188_v58 = vpop.f32.mrb[14].mxu1 }
 0x1ca   : > { %1230 = vmatpush3.bf16.xpose.msra.mxu0 %v1229_v54  ;;  %1359 = vtanh.f32 %v757_v55  ;;  %v760_v59 = vadd.f32 %v1188_v58, %v1076_v31  ;;  %v751_v60 = vpop.f32.mrb[15].mxu1 }
 0x1cb   : > { %1231 = vmatprep.subr.bf16.mxu0 %v1600_v26  ;;  %1361 = vtanh.f32 %v749_v57  ;;  %v752_v61 = vadd.f32 %v1076_v31, %v751_v60 }
 0x1cc   : > { %v1352_v62 = vpop.eup %1351  ;;  %1363 = vtanh.f32 %v760_v59 }
 0x1cd   : > { %v1354_v63 = vpop.eup %1353  ;;  %1365 = vtanh.f32 %v752_v61 }
 0x1ce   : > { %v1356_v0 = vpop.eup %1355 }
 0x1cf   : > { %v1358_v1 = vpop.eup %1357  ;;  %v1238_v2 = vpack.c.bf16 %v1356_v0, %v1352_v62  ;;  %v1191_v3 = vpop.f32.mrb[16].mxu1 }
 0x1d0   : > { %v1235_v4 = vpack.c.bf16 %v1358_v1, %v1354_v63  ;;  %v773_v5 = vadd.f32 %v1191_v3, %v1076_v31  ;;  %v764_v6 = vpop.f32.mrb[17].mxu1 }
 0x1d1   : > { %v765_v7 = vadd.f32 %v1076_v31, %v764_v6  ;;  %v1192_v8 = vpop.f32.mrb[18].mxu1 }
 0x1d2   : > { %1233 = vmatpush3.bf16.xpose.msra.mxu0 %v1232_v52  ;;  %1367 = vtanh.f32 %v773_v5  ;;  %v776_v9 = vadd.f32 %v1192_v8, %v1076_v31  ;;  %v767_v10 = vpop.f32.mrb[19].mxu1 }
 0x1d3   : > { %1234 = vmatprep.subr.bf16.mxu0 %v1600_v26  ;;  %1369 = vtanh.f32 %v765_v7  ;;  %v768_v11 = vadd.f32 %v1076_v31, %v767_v10 }
 0x1d4   : > { %v1360_v12 = vpop.eup %1359  ;;  %1371 = vtanh.f32 %v776_v9 }
 0x1d5   : > { %v1362_v13 = vpop.eup %1361  ;;  %1373 = vtanh.f32 %v768_v11 }
 0x1d6   : > { %v1364_v14 = vpop.eup %1363  ;;  %1375 = vtanh.f32 %v530_v23 }
 0x1d7   : > { %v1366_v15 = vpop.eup %1365  ;;  %v1244_v16 = vpack.c.bf16 %v1364_v14, %v1360_v12 }
 0x1d8   : > { %v1241_v17 = vpack.c.bf16 %v1366_v15, %v1362_v13 }
 0x1da   : > { %1236 = vmatpush3.bf16.xpose.msra.mxu0 %v1235_v4 }
 0x1db   : > { %1237 = vmatprep.subr.bf16.mxu0 %v1600_v26 }
 0x1dc   : > { %v1368_v18 = vpop.eup %1367 }
 0x1dd   : > { %v1370_v20 = vpop.eup %1369 }
 0x1de   : > { %v1372_v21 = vpop.eup %1371 }
 0x1df   : > { %v1374_v22 = vpop.eup %1373  ;;  %v1250_v24 = vpack.c.bf16 %v1372_v21, %v1368_v18 }
 0x1e0   : > { %v1247_v25 = vpack.c.bf16 %v1374_v22, %v1370_v20  ;;  %v1376_v31 = vpop.eup %1375 }
 0x1e1   : > { %v540_v32 = vsel %vm539_vm1, %v1376_v31, 0.0 }
 0x1e2   : > { %1239 = vmatpush3.bf16.xpose.msra.mxu0 %v1238_v2  ;;  %v541_v27 = vrot.slane %v540_v32, 4 }
 0x1e3   : > { %1240 = vmatprep.subr.bf16.mxu0 %v1600_v26 }
 0x1e4   : > { %v542_v33 = vadd.f32 %v541_v27, %v540_v32 }
 0x1e6   : > { %v543_v34 = vrot.slane %v542_v33, 2 }
 0x1e8   : > { %v544_v35 = vadd.f32 %v543_v34, %v542_v33 }
 0x1ea   : > { %1242 = vmatpush3.bf16.xpose.msra.mxu0 %v1241_v17  ;;  %v545_v36 = vrot.slane %v544_v35, 1 }
 0x1eb   : > { %1243 = vmatprep.subr.bf16.mxu0 %v1600_v26 }
 0x1ec   : > { %v546_v37 = vadd.f32 %v545_v36, %v544_v35 }
 0x1f2   : > { %1245 = vmatpush3.bf16.xpose.msra.mxu0 %v1244_v16 }
 0x1f3   : > { %1246 = vmatprep.subr.bf16.mxu0 %v1600_v26 }
 0x1fa   : > { %1248 = vmatpush3.bf16.xpose.msra.mxu0 %v1247_v25 }
 0x1fb   : > { %1249 = vmatprep.subr.bf16.mxu0 %v1600_v26 }
 0x202   : > { %1251 = vmatpush3.bf16.xpose.msra.mxu0 %v1250_v24 }
 0x209   : > { %1226 = vmatmul.mubr.f32.vlgmr.msra.gmra.mrb[0].mxu0 %v546_v37 }
 0x2dc   : > { %v861_v40 = vpop.f32.mrb[0].mxu0 }
 0x2dd   : > { %v869_v41 = vsel %vm868_vm2, %v861_v40, -inf  ;;  %v1227_v42 = vpop.f32.mrb[1].mxu0 }
 0x2de   : > { %v871_v43 = vsel %vm870_vm3, %v869_v41, -inf }
 0x2df   : > { %872 = vmax.xlane.f32.xlu0 %v871_v43 }
 0x36c   : > { %v873_v26 = vpop.xlane.xlu0 %872 }
 0x36d   : > { %v874_v44 = vsub.f32 %v869_v41, %v873_v26 }
 0x36f   : > { %v875_v45 = vmul.f32 1.442695, %v874_v44 }
 0x371   : > { %1377 = vpow2.f32 %v875_v45 }
 0x37b   : > { %v1378_v46 = vpop.eup %1377 }
 0x37c   : > { %v877_v47 = vsel %vm868_vm2, %v1378_v46, 0.0 }
 0x37d   : > { %v878_v48 = vsel %vm870_vm3, %v877_v47, 0.0 }
 0x37e   : > { %879 = vadd.xlane.f32.xlu0 %v878_v48 }
 0x40b   : > { %v880_v49 = vpop.xlane.xlu0 %879 }
 0x40c   : > { %1379 = vrcp.f32 %v880_v49 }
 0x416   : > { %v1380_v50 = vpop.eup %1379 }
 0x417   : > { %v882_v51 = vmul.f32 %v1380_v50, %v877_v47 }
 0x419   : > { %883 = vst [vmem:[%s411_s18] sm:$0x1] %v882_v51 }
 0x41a   : > { %1526 = shalt.err (!%p1523_p12)
}
 0x41b   : > { %s1527_s12 = scalar_lea.hbm %s1941_s25, 16  ;;  %s1531_s23 = scalar_lea.hbm %s1991_s7, 80 }
 0x41c   : > { %p1528_p9 = scmp.ne.s32.totalorder %s1941_s25, %s1527_s12  ;;  %p1532_p6 = scmp.lt.u32.totalorder %s1941_s25, %s1991_s7 }
 0x41d   : > { %p1533_p10 = scmp.lt.u32.totalorder %s1531_s23, %s1527_s12  ;;  %p1535_p4 = scmp.lt.u32.totalorder %s1527_s12, %s1941_s25 }
 0x41e   : > { %p1529_p11 = pnand %p1528_p9, %p2022_p8 }
 0x41f   : > { %p1534_p13 = por %p1533_p10, %p1532_p6 }
 0x420   : > { %p1530_p1 = pneg %p1529_p11 }
 0x421   : > { %p1536_p0 = por %p1535_p4, %p1534_p13 }
 0x423   : > { %p1537_p3 = pnand %p1536_p0, %p1530_p1 }
 0x425   : > { %1540 = shalt.err (!%p1537_p3)
}
 0x426   : > { %1260 = dma.vmem_to_hbm [thread:$0]  (%p2022_p8), %s1943_s13, 16, %s1941_s25, %s885_s10  }
 0x427 PF: > { %s2023_s11 = sld [smem:[#allocation21_spill]]  ;;  %p1280_p2 = scmp.ge.s32.totalorder %s1589_s8, 2 }
 0x428   : > { %s909_s14 = sand.u32 1, %s1577_s0  }
 0x429   : > { %s910_s24 = scalar_lea.sflag [#allocation6], %s909_s14 }
 0x42d   : > { %p2024_p5 = scmp.ne.s32.totalorder %s2023_s11, 0 }
 0x42f   : > { %p1276_p7 = pnand %p1280_p2, %p2024_p5 }
 0x431   : > { %1572 = dma.done.wait (!%p1276_p7), %s910_s24, 16  }
 0x432   : > { %1574 = vsyncadd (!%p1276_p7), %s910_s24, 4294967280  ;;  %s2025_s8 = sld [smem:[#allocation19_spill]]  ;;  %s2026_s28 = sld [smem:[#allocation18_spill]] }
 0x433   : > { %s2027_s30 = sld [smem:[#allocation20_spill]]  ;;  %s2028_s0 = smov %s1581_s29 }
 0x438   : > { %p32_p12 = scmp.ge.s32.totalorder %s2025_s8, 7   ;;  %s2029_s29 = smov %s2026_s28 }
 0x43a   :  { %34 = sbr.rel (!%p32_p12) target bundleno = 24 (0x18), region = 132 }
 0x441   :  { %914 = vsyncpa [#allocation5], 1 }
 0x442   :  { %916 = vsyncpa [#allocation5 + $0x1], 1 }
 0x443   :  { %917 = vsyncpa [#allocation8], 1 }
 0x444   :  { %919 = vsyncpa [#allocation8 + $0x1], 1 }
 0x445   :  { %920 = vsyncpa [#allocation11], 1 }
 0x446   :  { %922 = vsyncpa [#allocation11 + $0x1], 1 }
 0x447   :  { %923 = vsyncpa [#allocation6], 1 }
 0x448   :  { %925 = vsyncpa [#allocation6 + $0x1], 1 }

</bundles_post_ra>
